<compile_context>
chip_gen: v5e
topology: v5e:2x2
jax: 0.10.0
libtpu: 0.0.40
codegen_flags: <defaults>
</compile_context>

<pallas_src>
import jax
import jax.numpy as jnp
from jax.experimental import pallas as pl
from jax.experimental.pallas import tpu as pltpu

_LANE = 128
_SUBLANE = 8
_MAX_TB = 512


def _round_up(n, m):
    return ((n + m - 1) // m) * m


def net_kernel(x_ref, w1_ref, b1_ref, w2_ref, b2_ref, o_ref):
    # encoder: Linear + ReLU  (bf16 MXU matmul, f32 accumulation; VPU bias/ReLU)
    h = jnp.dot(x_ref[...], w1_ref[...], preferred_element_type=jnp.float32)
    h = jnp.maximum(h + b1_ref[...], 0.0)            # b1 [1, H_pad] broadcasts
    # decider: Linear (activations re-cast to bf16 -> single bf16 MXU pass)
    y = jnp.dot(h.astype(jnp.bfloat16), w2_ref[...],
                preferred_element_type=jnp.float32)
    o_ref[...] = (y + b2_ref[...]).astype(o_ref.dtype)


def prepare_params(w1, b1, w2, b2):
    """One-time (init) parameter prep: lane-dense zero pad + bf16 weight cast.

    Hoisted out of the per-call path so the HBM->HBM pad copies happen once.
    Biases stay f32 (added after f32 accumulation); padding is numerically exact.
    """
    D_in, H = w1.shape
    D_out = w2.shape[1]
    H_pad = _round_up(H, _LANE)
    D_out_pad = _round_up(D_out, _LANE)

    w1_p = jnp.pad(w1, ((0, 0), (0, H_pad - H))).astype(jnp.bfloat16)
    b1_p = jnp.pad(b1.reshape(1, H), ((0, 0), (0, H_pad - H))).astype(jnp.float32)
    w2_p = jnp.pad(w2, ((0, H_pad - H), (0, D_out_pad - D_out))).astype(jnp.bfloat16)
    b2_p = jnp.pad(b2.reshape(1, D_out),
                   ((0, 0), (0, D_out_pad - D_out))).astype(jnp.float32)
    return (w1_p, b1_p, w2_p, b2_p)


def net_forward_padded(x, w1_p, b1_p, w2_p, b2_p):
    """x:[B, D_in] -> padded output [B_pad, D_out_pad] (f32).

    Rows >= B and columns >= D_out are padding artifacts (generally non-zero);
    consumers must slice or mask them.
    """
    B, D_in = x.shape
    H_pad = w1_p.shape[1]
    D_out_pad = w2_p.shape[1]

    # One big batch tile (up to 512 rows): no per-step overhead for small B and
    # full 256-row MXU occupancy on v6e/v7x; larger B pipelines over the grid.
    TB = min(_round_up(B, _SUBLANE), _MAX_TB)
    B_pad = _round_up(B, TB)
    if B_pad != B:
        x = jnp.pad(x, ((0, B_pad - B), (0, 0)))
    x_p = x.astype(jnp.bfloat16)
    grid = (B_pad // TB,)

    flops = 2 * B_pad * (D_in * H_pad + H_pad * D_out_pad)
    bytes_accessed = (
        B_pad * D_in * 2                       # bf16 activations
        + w1_p.size * 2 + w2_p.size * 2        # bf16 resident weights
        + b1_p.size * 4 + b2_p.size * 4        # f32 biases
        + B_pad * D_out_pad * 4                # f32 output
    )

    return pl.pallas_call(
        net_kernel,
        out_shape=jax.ShapeDtypeStruct((B_pad, D_out_pad), jnp.float32),
        grid=grid,
        in_specs=[
            # Activations: batch-tiled, auto double-buffered.  D_in is kept
            # un-padded (equals full array dim -> legal block; padding K would
            # only add DMA bytes with zero useful FLOPs).
            pl.BlockSpec((TB, D_in), lambda i: (i, 0)),
            # Weights / biases: constant block index -> DMA'd once, stay
            # VMEM-resident across grid steps (weight-stationary).
            pl.BlockSpec((D_in, H_pad), lambda i: (0, 0)),
            pl.BlockSpec((1, H_pad), lambda i: (0, 0)),
            pl.BlockSpec((H_pad, D_out_pad), lambda i: (0, 0)),
            pl.BlockSpec((1, D_out_pad), lambda i: (0, 0)),
        ],
        out_specs=pl.BlockSpec((TB, D_out_pad), lambda i: (i, 0)),
        compiler_params=pltpu.CompilerParams(
            # Batch axis is independent; shards across v7x's 2 TCs when the grid
            # has several steps per core, no-op otherwise.
            dimension_semantics=("parallel",),
            # VMEM footprint here is < 1 MiB; set vmem_limit_bytes and re-derive
            # TB only if H/D_out grow by orders of magnitude (v7x: 64 MiB).
        ),
        cost_estimate=pl.CostEstimate(
            flops=flops, transcendentals=0, bytes_accessed=bytes_accessed),
    )(x_p, w1_p, b1_p, w2_p, b2_p)


def net_forward(x, params, d_out):
    """Logical [B, D_out] output (slices off lane/batch padding)."""
    out_p = net_forward_padded(x, *params)
    return out_p[: x.shape[0], :d_out]


def reference_forward_bf16(x, w1, b1, w2, b2):
    # bf16-consistent reference: matches the kernel's bf16 inputs and the bf16
    # re-cast of the hidden activations, with f32 accumulation.
    f32 = lambda a: a.astype(jnp.bfloat16).astype(jnp.float32)
    h = jnp.maximum(f32(x) @ f32(w1) + b1, 0.0)
    return f32(h) @ f32(w2) + b2


if __name__ == "__main__":
    # Logical module: encoder = Linear(32 -> 64) + ReLU, decider = Linear(64 -> 16).
    # Batch 256 so the MXU rows are actually filled (one 256-row grid step).
    B, D_in, H, D_out = 256, 32, 64, 16

    key = jax.random.PRNGKey(0)
    kx, k1, k2, k3, k4 = jax.random.split(key, 5)
    x = jax.random.normal(kx, (B, D_in), dtype=jnp.float32)
    w1 = jax.random.normal(k1, (D_in, H), dtype=jnp.float32) / jnp.sqrt(D_in)
    b1 = jax.random.normal(k2, (1, H), dtype=jnp.float32) * 0.01
    w2 = jax.random.normal(k3, (H, D_out), dtype=jnp.float32) / jnp.sqrt(H)
    b2 = jax.random.normal(k4, (1, D_out), dtype=jnp.float32) * 0.01

    # One-time parameter prep (padding + bf16), hoisted out of the call path.
    params = prepare_params(w1, b1, w2, b2)
    params = tuple(jax.block_until_ready(p) for p in params)

    fwd = jax.jit(net_forward_padded)
    out_padded = jax.block_until_ready(fwd(x, *params))
    # Consumers that tolerate lane/batch padding can use out_padded directly;
    # here we slice to the module's logical [B, D_out] output for the check.
    out = out_padded[:B, :D_out]

    ref = reference_forward_bf16(x, w1, b1, w2, b2)
    assert out.shape == (B, D_out)
    assert jnp.allclose(out, ref, atol=1e-2, rtol=1e-2), "mismatch vs reference"

    print("KERNEL_OK")
</pallas_src>

<mosaic_0001>
module attributes {stable_mosaic.version = 11 : i64} {
  func.func @net_kernel(%arg0: i32, %arg1: memref<256x32xbf16, #tpu.memory_space<vmem>>, %arg2: memref<32x128xbf16, #tpu.memory_space<vmem>>, %arg3: memref<1x128xf32, #tpu.memory_space<vmem>>, %arg4: memref<128x128xbf16, #tpu.memory_space<vmem>>, %arg5: memref<1x128xf32, #tpu.memory_space<vmem>>, %arg6: memref<256x128xf32, #tpu.memory_space<vmem>>) attributes {dimension_semantics = [#tpu.dimension_semantics<parallel>], iteration_bounds = array<i64: 1>, scalar_prefetch = 0 : i64, scratch_operands = 0 : i64, tpu.core_type = #tpu.core_type<tc>, window_params = [{transform_indices = @transform_0, window_bounds = array<i64: 256, 32>}, {pipeline_mode = #tpu.pipeline_mode<synchronous>, transform_indices = @transform_1, window_bounds = array<i64: 32, 128>}, {pipeline_mode = #tpu.pipeline_mode<synchronous>, transform_indices = @transform_2, window_bounds = array<i64: 1, 128>}, {pipeline_mode = #tpu.pipeline_mode<synchronous>, transform_indices = @transform_3, window_bounds = array<i64: 128, 128>}, {pipeline_mode = #tpu.pipeline_mode<synchronous>, transform_indices = @transform_4, window_bounds = array<i64: 1, 128>}, {transform_indices = @transform_5, window_bounds = array<i64: 256, 128>}]} {
    %c0 = arith.constant 0 : index
    %c0_0 = arith.constant 0 : index
    %0 = vector.load %arg1[%c0, %c0_0] : memref<256x32xbf16, #tpu.memory_space<vmem>>, vector<256x32xbf16>
    %c0_1 = arith.constant 0 : index
    %c0_2 = arith.constant 0 : index
    %1 = vector.load %arg2[%c0_1, %c0_2] : memref<32x128xbf16, #tpu.memory_space<vmem>>, vector<32x128xbf16>
    %cst = arith.constant dense<0.000000e+00> : vector<256x128xf32>
    %2 = tpu.matmul %0, %1, %cst {dimension_numbers = #tpu.dot_dimension_numbers<[1], [0], [0], [1], [0, 0, 1, 1], [], []>} : vector<256x32xbf16>, vector<32x128xbf16>, vector<256x128xf32> -> vector<256x128xf32>
    %c0_3 = arith.constant 0 : index
    %c0_4 = arith.constant 0 : index
    %3 = vector.load %arg3[%c0_3, %c0_4] : memref<1x128xf32, #tpu.memory_space<vmem>>, vector<1x128xf32>
    %4 = vector.broadcast %3 : vector<1x128xf32> to vector<256x128xf32>
    %5 = arith.addf %2, %4 : vector<256x128xf32>
    %cst_5 = arith.constant 0.000000e+00 : f32
    %6 = vector.broadcast %cst_5 : f32 to vector<256x128xf32>
    %7 = arith.maximumf %5, %6 : vector<256x128xf32>
    %8 = arith.truncf %7 : vector<256x128xf32> to vector<256x128xbf16>
    %c0_6 = arith.constant 0 : index
    %c0_7 = arith.constant 0 : index
    %9 = vector.load %arg4[%c0_6, %c0_7] : memref<128x128xbf16, #tpu.memory_space<vmem>>, vector<128x128xbf16>
    %cst_8 = arith.constant dense<0.000000e+00> : vector<256x128xf32>
    %10 = tpu.matmul %8, %9, %cst_8 {dimension_numbers = #tpu.dot_dimension_numbers<[1], [0], [0], [1], [0, 0, 1, 1], [], []>} : vector<256x128xbf16>, vector<128x128xbf16>, vector<256x128xf32> -> vector<256x128xf32>
    %c0_9 = arith.constant 0 : index
    %c0_10 = arith.constant 0 : index
    %11 = vector.load %arg5[%c0_9, %c0_10] : memref<1x128xf32, #tpu.memory_space<vmem>>, vector<1x128xf32>
    %12 = vector.broadcast %11 : vector<1x128xf32> to vector<256x128xf32>
    %13 = arith.addf %10, %12 : vector<256x128xf32>
    %c0_11 = arith.constant 0 : index
    %c0_12 = arith.constant 0 : index
    %14 = vector.load %arg6[%c0_11, %c0_12] : memref<256x128xf32, #tpu.memory_space<vmem>>, vector<256x128xf32>
    tpu.vector_store %arg6[%c0_11, %c0_12], %13 {strides = array<i32>} : memref<256x128xf32, #tpu.memory_space<vmem>>, vector<256x128xf32>,
    return
  }
  func.func @transform_0(%arg0: i32) -> (i32, i32) {
    %c0_i32 = arith.constant 0 : i32
    %c0_i32_0 = arith.constant 0 : i32
    return %arg0, %c0_i32 : i32, i32
  }
  func.func @transform_1(%arg0: i32) -> (i32, i32) {
    %c0_i32 = arith.constant 0 : i32
    %c0_i32_0 = arith.constant 0 : i32
    %c0_i32_1 = arith.constant 0 : i32
    return %c0_i32, %c0_i32_0 : i32, i32
  }
  func.func @transform_2(%arg0: i32) -> (i32, i32) {
    %c0_i32 = arith.constant 0 : i32
    %c0_i32_0 = arith.constant 0 : i32
    %c0_i32_1 = arith.constant 0 : i32
    return %c0_i32, %c0_i32_0 : i32, i32
  }
  func.func @transform_3(%arg0: i32) -> (i32, i32) {
    %c0_i32 = arith.constant 0 : i32
    %c0_i32_0 = arith.constant 0 : i32
    %c0_i32_1 = arith.constant 0 : i32
    return %c0_i32, %c0_i32_0 : i32, i32
  }
  func.func @transform_4(%arg0: i32) -> (i32, i32) {
    %c0_i32 = arith.constant 0 : i32
    %c0_i32_0 = arith.constant 0 : i32
    %c0_i32_1 = arith.constant 0 : i32
    return %c0_i32, %c0_i32_0 : i32, i32
  }
  func.func @transform_5(%arg0: i32) -> (i32, i32) {
    %c0_i32 = arith.constant 0 : i32
    %c0_i32_0 = arith.constant 0 : i32
    return %arg0, %c0_i32 : i32, i32
  }
}

</mosaic_0001>

<bundles_post_ra>
// kernel: net_forward_padded.1
= control target key start
LH: loop header
LB: loop body
LE: loop exit
PB: predicated region body
PF: predicated region fallthrough
CT: control target
= control target key end

     0   :  { %s938_s0 = inlined_call_operand.vmem [shape: bf16[256,32], index: 0, kind: input, shape index: {}]   ;;  %s939_s1 = inlined_call_operand.vmem [shape: bf16[32,128], index: 1, kind: input, shape index: {}]   ;;  %s940_s2 = inlined_call_operand.vmem [shape: f32[1,128], index: 2, kind: input, shape index: {}]   ;;  %s941_s3 = inlined_call_operand.vmem [shape: bf16[128,128], index: 3, kind: input, shape index: {}]   ;;  %s942_s4 = inlined_call_operand.vmem [shape: f32[1,128], index: 4, kind: input, shape index: {}]   ;;  %s943_s5 = inlined_call_operand.hbm [shape: f32[256,128], index: 5, kind: output, shape index: {}]  }
   0x1   :  { %v684_v0 = vld [vmem:[%s939_s1 + $0x8] sm:$0xff]  ;;  %v683_v1 = vld [vmem:[%s939_s1] sm:$0xff] }
   0x2   :  { %209 = vmatpush.bf16.msra.mxu0 %v684_v0  ;;  %693 = vmatpush.bf16.msra.mxu3 %v684_v0 }
   0x3   :  { %10 = vsyncpa [#allocation3], 0  ;;  %v667_v2 = vld [vmem:[%s938_s0] sm:$0xff]  ;;  %vm154_vm0 = vcmask 261120   ;;  %v668_v3 = vld [vmem:[%s938_s0 + $0x8] sm:$0xff]  ;;  %s535_s22 = sshll.u32 %s943_s5, 4  ;;  %s536_s22 = int_to_ptr.hbm [resolvable:$true] %s535_s22 }
   0x4   :  { %v669_v4 = vld [vmem:[%s938_s0 + $0x10] sm:$0xff]  ;;  %v670_v5 = vld [vmem:[%s938_s0 + $0x18] sm:$0xff]  ;;  %v671_v6 = vld [vmem:[%s938_s0 + $0x20] sm:$0xff]  ;;  %s735_s23 = smov 128   ;;  %s736_s24 = smov 8  }
   0x5   :  { %v692_v7 = vld [vmem:[%s941_s3 + $0x38] sm:$0xff]  ;;  %v672_v8 = vld [vmem:[%s938_s0 + $0x28] sm:$0xff]  ;;  %v691_v9 = vld [vmem:[%s941_s3 + $0x30] sm:$0xff] }
   0x6   :  { %210 = vmatpush.bf16.msra.mxu0 %v683_v1  ;;  %694 = vmatpush.bf16.msra.mxu3 %v683_v1  ;;  %v690_v10 = vld [vmem:[%s941_s3 + $0x28] sm:$0xff]  ;;  %v689_v11 = vld [vmem:[%s941_s3 + $0x20] sm:$0xff]  ;;  %v688_v12 = vld [vmem:[%s941_s3 + $0x18] sm:$0xff] }
   0x7   :  { %408 = vmatpush.bf16.msra.mxu1 %v692_v7  ;;  %695 = vmatpush.bf16.msra.mxu2 %v692_v7  ;;  %v673_v13 = vld [vmem:[%s938_s0 + $0x30] sm:$0xff]  ;;  %v676_v15 = vld [vmem:[%s938_s0 + $0x48] sm:$0xff]  ;;  %v685_v17 = vld [vmem:[%s941_s3] sm:$0xff] }
   0x8   :  { %v687_v14 = vld [vmem:[%s941_s3 + $0x10] sm:$0xff]  ;;  %v686_v16 = vld [vmem:[%s941_s3 + $0x8] sm:$0xff]  ;;  %v674_v18 = vld [vmem:[%s938_s0 + $0x38] sm:$0xff] }
   0x9   :  { %619 = vmatmul.msk.bf16.vlgmr.msra.gmra.mxu0 %vm154_vm0, %v667_v2  ;;  %628 = vmatmul.msk.bf16.vlgmr.msra.gmra.mxu3 %vm154_vm0, %v676_v15  ;;  %v677_v19 = vld [vmem:[%s938_s0 + $0x50] sm:$0xff]  ;;  %v675_v20 = vld [vmem:[%s938_s0 + $0x40] sm:$0xff]  ;;  %v678_v23 = vld [vmem:[%s938_s0 + $0x58] sm:$0xff] }
   0xa   :  { %v843_v22 = vld [vmem:[%s940_s2] ss:$0 sm:$0xff]  ;;  %v680_v39 = vld [vmem:[%s938_s0 + $0x68] sm:$0xff]  ;;  %v681_v47 = vld [vmem:[%s938_s0 + $0x70] sm:$0xff] }
   0xb   :  { %409 = vmatpush.bf16.msra.mxu1 %v691_v9  ;;  %696 = vmatpush.bf16.msra.mxu2 %v691_v9  ;;  %v679_v31 = vld [vmem:[%s938_s0 + $0x60] sm:$0xff]  ;;  %v682_v55 = vld [vmem:[%s938_s0 + $0x78] sm:$0xff] }
   0xf   :  { %410 = vmatpush.bf16.msra.mxu1 %v690_v10  ;;  %697 = vmatpush.bf16.msra.mxu2 %v690_v10 }
  0x13   :  { %411 = vmatpush.bf16.msra.mxu1 %v689_v11  ;;  %698 = vmatpush.bf16.msra.mxu2 %v689_v11 }
  0x17   :  { %412 = vmatpush.bf16.msra.mxu1 %v688_v12  ;;  %699 = vmatpush.bf16.msra.mxu2 %v688_v12 }
  0x19   :  { %620 = vmatmul.msk.bf16.gmra.mxu0 %vm154_vm0, %v668_v3  ;;  %629 = vmatmul.msk.bf16.gmra.mxu3 %vm154_vm0, %v677_v19 }
  0x1b   :  { %413 = vmatpush.bf16.msra.mxu1 %v687_v14  ;;  %700 = vmatpush.bf16.msra.mxu2 %v687_v14 }
  0x1f   :  { %414 = vmatpush.bf16.msra.mxu1 %v686_v16  ;;  %701 = vmatpush.bf16.msra.mxu2 %v686_v16 }
  0x23   :  { %415 = vmatpush.bf16.msra.mxu1 %v685_v17  ;;  %702 = vmatpush.bf16.msra.mxu2 %v685_v17 }
  0x29   :  { %621 = vmatmul.msk.bf16.gmra.mxu0 %vm154_vm0, %v669_v4  ;;  %630 = vmatmul.msk.bf16.gmra.mxu3 %vm154_vm0, %v678_v23 }
  0x39   :  { %622 = vmatmul.msk.bf16.gmra.mxu0 %vm154_vm0, %v670_v5  ;;  %631 = vmatmul.msk.bf16.gmra.mxu3 %vm154_vm0, %v679_v31 }
  0x49   :  { %623 = vmatmul.msk.bf16.gmra.mxu0 %vm154_vm0, %v671_v6  ;;  %632 = vmatmul.msk.bf16.gmra.mxu3 %vm154_vm0, %v680_v39 }
  0x59   :  { %624 = vmatmul.msk.bf16.gmra.mxu0 %vm154_vm0, %v672_v8  ;;  %633 = vmatmul.msk.bf16.gmra.mxu3 %vm154_vm0, %v681_v47 }
  0x69   :  { %625 = vmatmul.msk.bf16.gmra.mxu0 %vm154_vm0, %v673_v13  ;;  %634 = vmatmul.msk.bf16.gmra.mxu3 %vm154_vm0, %v682_v55 }
  0x79   :  { %626 = vmatmul.msk.bf16.gmra.mxu0 %vm154_vm0, %v674_v18 }
  0x86   :  { %v212_v21 = vpop.f32.mrf.mxu0 }
  0x87   :  { %v213_v24 = vadd.f32 %v843_v22, %v212_v21 }
  0x89   :  { %627 = vmatmul.msk.bf16.gmra.mxu0 %vm154_vm0, %v675_v20  ;;  %v292_v27 = vmax.f32 %v213_v24, 0.0 }
  0x8c   :  { %v257_v13 = vpop.f32.mrf.mxu3 }
  0x8e   :  { %v214_v25 = vpop.f32.mrf.mxu0 }
  0x8f   :  { %v215_v26 = vadd.f32 %v843_v22, %v214_v25 }
  0x91   :  { %v293_v28 = vmax.f32 %v215_v26, 0.0 }
  0x93   :  { %v324_v29 = vpack.c.bf16 %v293_v28, %v292_v27  ;;  %v887_v27 = vld [vmem:[%s942_s4] ss:$0 sm:$0xff]  ;;  %s734_s4 = smov [#allocation2]  }
  0x94   :  { %v259_v17 = vpop.f32.mrf.mxu3  ;;  %s533_s19 = sshll.u32 %s734_s4, 4  ;;  %s534_s19 = int_to_ptr.vmem [resolvable:$true] %s533_s19 }
  0x95   :  { %416 = vmatmul.bf16.vlgmr.msra.gmra.mxu1 %v324_v29 }
  0x96   :  { %v217_v30 = vpop.f32.mrf.mxu0 }
  0x97   :  { %v218_v32 = vadd.f32 %v843_v22, %v217_v30 }
  0x99   :  { %v294_v35 = vmax.f32 %v218_v32, 0.0 }
  0x9c   :  { %v262_v23 = vpop.f32.mrf.mxu3 }
  0x9e   :  { %v219_v33 = vpop.f32.mrf.mxu0 }
  0x9f   :  { %v220_v34 = vadd.f32 %v843_v22, %v219_v33 }
  0xa1   :  { %v295_v36 = vmax.f32 %v220_v34, 0.0 }
  0xa3   :  { %v325_v37 = vpack.c.bf16 %v295_v36, %v294_v35  ;;  %v258_v35 = vadd.f32 %v843_v22, %v257_v13  ;;  %v260_v36 = vadd.f32 %v843_v22, %v259_v17 }
  0xa4   :  { %v264_v33 = vpop.f32.mrf.mxu3 }
  0xa5   :  { %421 = vmatmul.bf16.gmra.mxu1 %v325_v37  ;;  %v310_v39 = vmax.f32 %v258_v35, 0.0  ;;  %v265_v47 = vadd.f32 %v843_v22, %v264_v33 }
  0xa6   :  { %v222_v38 = vpop.f32.mrf.mxu0 }
  0xa7   :  { %v223_v40 = vadd.f32 %v843_v22, %v222_v38 }
  0xa9   :  { %v296_v43 = vmax.f32 %v223_v40, 0.0  ;;  %v311_v40 = vmax.f32 %v260_v36, 0.0 }
  0xac   :  { %v267_v38 = vpop.f32.mrf.mxu3 }
  0xae   :  { %v224_v41 = vpop.f32.mrf.mxu0 }
  0xaf   :  { %v225_v42 = vadd.f32 %v843_v22, %v224_v41 }
  0xb1   :  { %v297_v44 = vmax.f32 %v225_v42, 0.0 }
  0xb3   :  { %v326_v45 = vpack.c.bf16 %v297_v44, %v296_v43  ;;  %v333_v43 = vpack.c.bf16 %v311_v40, %v310_v39 }
  0xb4   :  { %v269_v44 = vpop.f32.mrf.mxu3 }
  0xb5   :  { %426 = vmatmul.bf16.gmra.mxu1 %v326_v45 }
  0xb6   :  { %v227_v46 = vpop.f32.mrf.mxu0 }
  0xb7   :  { %v228_v48 = vadd.f32 %v843_v22, %v227_v46  ;;  %v263_v46 = vadd.f32 %v843_v22, %v262_v23 }
  0xb9   :  { %v298_v51 = vmax.f32 %v228_v48, 0.0 }
  0xbe   :  { %v229_v49 = vpop.f32.mrf.mxu0 }
  0xbf   :  { %v230_v50 = vadd.f32 %v843_v22, %v229_v49  ;;  %v312_v49 = vmax.f32 %v263_v46, 0.0 }
  0xc1   :  { %v299_v52 = vmax.f32 %v230_v50, 0.0  ;;  %v313_v50 = vmax.f32 %v265_v47, 0.0 }
  0xc3   :  { %v327_v53 = vpack.c.bf16 %v299_v52, %v298_v51  ;;  %v272_v52 = vpop.f32.mrf.mxu3 }
  0xc5   :  { %431 = vmatmul.bf16.gmra.mxu1 %v327_v53 }
  0xc6   :  { %v232_v54 = vpop.f32.mrf.mxu0 }
  0xc7   :  { %v233_v56 = vadd.f32 %v843_v22, %v232_v54  ;;  %v334_v54 = vpack.c.bf16 %v313_v50, %v312_v49 }
  0xc9   :  { %v300_v59 = vmax.f32 %v233_v56, 0.0  ;;  %v268_v56 = vadd.f32 %v843_v22, %v267_v38 }
  0xce   :  { %v234_v57 = vpop.f32.mrf.mxu0 }
  0xcf   :  { %v235_v58 = vadd.f32 %v843_v22, %v234_v57  ;;  %v270_v57 = vadd.f32 %v843_v22, %v269_v44 }
  0xd1   :  { %v301_v60 = vmax.f32 %v235_v58, 0.0 }
  0xd3   :  { %v328_v61 = vpack.c.bf16 %v301_v60, %v300_v59  ;;  %v274_v59 = vpop.f32.mrf.mxu3  ;;  %v314_v60 = vmax.f32 %v268_v56, 0.0 }
  0xd5   :  { %436 = vmatmul.bf16.gmra.mxu1 %v328_v61  ;;  %v315_v61 = vmax.f32 %v270_v57, 0.0 }
  0xd6   :  { %v237_v62 = vpop.f32.mrf.mxu0 }
  0xd7   :  { %v238_v63 = vadd.f32 %v843_v22, %v237_v62 }
  0xd9   :  { %v302_v2 = vmax.f32 %v238_v63, 0.0 }
  0xde   :  { %v239_v0 = vpop.f32.mrf.mxu0 }
  0xdf   :  { %v240_v1 = vadd.f32 %v843_v22, %v239_v0  ;;  %v335_v0 = vpack.c.bf16 %v315_v61, %v314_v60 }
  0xe1   :  { %v303_v3 = vmax.f32 %v240_v1, 0.0  ;;  %v277_v1 = vpop.f32.mrf.mxu3 }
  0xe3   :  { %v329_v4 = vpack.c.bf16 %v303_v3, %v302_v2  ;;  %v273_v3 = vadd.f32 %v843_v22, %v272_v52 }
  0xe5   :  { %441 = vmatmul.bf16.gmra.mxu1 %v329_v4  ;;  %v275_v4 = vadd.f32 %v843_v22, %v274_v59 }
  0xe6   :  { %v242_v5 = vpop.f32.mrf.mxu0 }
  0xe7   :  { %v243_v6 = vadd.f32 %v843_v22, %v242_v5 }
  0xe9   :  { %v304_v9 = vmax.f32 %v243_v6, 0.0  ;;  %v316_v6 = vmax.f32 %v273_v3, 0.0 }
  0xee   :  { %v244_v7 = vpop.f32.mrf.mxu0 }
  0xef   :  { %v245_v8 = vadd.f32 %v843_v22, %v244_v7  ;;  %v317_v7 = vmax.f32 %v275_v4, 0.0 }
  0xf1   :  { %v305_v10 = vmax.f32 %v245_v8, 0.0  ;;  %v279_v8 = vpop.f32.mrf.mxu3 }
  0xf3   :  { %v330_v11 = vpack.c.bf16 %v305_v10, %v304_v9 }
  0xf5   :  { %446 = vmatmul.bf16.gmra.mxu1 %v330_v11  ;;  %v336_v11 = vpack.c.bf16 %v317_v7, %v316_v6 }
  0xf6   :  { %v247_v12 = vpop.f32.mrf.mxu0 }
  0xf7   :  { %v248_v14 = vadd.f32 %v843_v22, %v247_v12 }
  0xf9   :  { %v306_v18 = vmax.f32 %v248_v14, 0.0  ;;  %v282_v13 = vpop.f32.mrf.mxu3  ;;  %v278_v14 = vadd.f32 %v843_v22, %v277_v1 }
  0xfb   :  { %v318_v17 = vmax.f32 %v278_v14, 0.0 }
  0xfe   :  { %v249_v15 = vpop.f32.mrf.mxu0 }
  0xff   :  { %v250_v16 = vadd.f32 %v843_v22, %v249_v15  ;;  %v280_v15 = vadd.f32 %v843_v22, %v279_v8 }
 0x101   :  { %v307_v19 = vmax.f32 %v250_v16, 0.0  ;;  %v284_v23 = vpop.f32.mrf.mxu3 }
 0x103   :  { %v331_v20 = vpack.c.bf16 %v307_v19, %v306_v18  ;;  %v319_v18 = vmax.f32 %v280_v15, 0.0 }
 0x105   :  { %451 = vmatmul.bf16.gmra.mxu1 %v331_v20 }
 0x106   :  { %v252_v21 = vpop.f32.mrf.mxu0 }
 0x107   :  { %v253_v24 = vadd.f32 %v843_v22, %v252_v21  ;;  %v337_v21 = vpack.c.bf16 %v319_v18, %v318_v17 }
 0x109   :  { %v308_v28 = vmax.f32 %v253_v24, 0.0 }
 0x10e   :  { %v254_v25 = vpop.f32.mrf.mxu0 }
 0x10f   :  { %v255_v26 = vadd.f32 %v843_v22, %v254_v25  ;;  %v283_v25 = vadd.f32 %v843_v22, %v282_v13 }
 0x111   :  { %v309_v29 = vmax.f32 %v255_v26, 0.0  ;;  %v285_v26 = vadd.f32 %v843_v22, %v284_v23 }
 0x112   :  { %v417_v30 = vpop.f32.mrf.mxu1 }
 0x113   :  { %v418_v31 = vadd.f32 %v887_v27, %v417_v30  ;;  %v332_v32 = vpack.c.bf16 %v309_v29, %v308_v28  ;;  %v287_v29 = vpop.f32.mrf.mxu3  ;;  %v320_v30 = vmax.f32 %v283_v25, 0.0 }
 0x115   :  { %497 = vst [vmem:[#allocation2] sm:$0xff] %v418_v31  ;;  %456 = vmatmul.bf16.vlgmr.msra.gmra.mxu2 %v332_v32  ;;  %v321_v31 = vmax.f32 %v285_v26, 0.0 }
 0x11a   :  { %v419_v34 = vpop.f32.mrf.mxu1 }
 0x11b   :  { %v420_v37 = vadd.f32 %v887_v27, %v419_v34  ;;  %v338_v34 = vpack.c.bf16 %v321_v31, %v320_v30  ;;  %v289_v35 = vpop.f32.mrf.mxu3 }
 0x11c   :  { %v290_v38 = vadd.f32 %v843_v22, %v289_v35 }
 0x11d   :  { %498 = vst [vmem:[#allocation2 + $0x8] sm:$0xff] %v420_v37  ;;  %v288_v37 = vadd.f32 %v843_v22, %v287_v29 }
 0x11f   :  { %v322_v40 = vmax.f32 %v288_v37, 0.0 }
 0x122   :  { %v422_v41 = vpop.f32.mrf.mxu1 }
 0x123   :  { %v423_v42 = vadd.f32 %v887_v27, %v422_v41  ;;  %v323_v41 = vmax.f32 %v290_v38, 0.0 }
 0x125   :  { %499 = vst [vmem:[#allocation2 + $0x10] sm:$0xff] %v423_v42  ;;  %461 = vmatmul.bf16.gmra.mxu2 %v333_v43  ;;  %v339_v44 = vpack.c.bf16 %v323_v41, %v322_v40 }
 0x12a   :  { %v424_v45 = vpop.f32.mrf.mxu1 }
 0x12b   :  { %v425_v48 = vadd.f32 %v887_v27, %v424_v45 }
 0x12d   :  { %500 = vst [vmem:[#allocation2 + $0x18] sm:$0xff] %v425_v48 }
 0x132   :  { %v427_v51 = vpop.f32.mrf.mxu1 }
 0x133   :  { %v428_v53 = vadd.f32 %v887_v27, %v427_v51 }
 0x135   :  { %501 = vst [vmem:[#allocation2 + $0x20] sm:$0xff] %v428_v53  ;;  %466 = vmatmul.bf16.gmra.mxu2 %v334_v54 }
 0x13a   :  { %v429_v55 = vpop.f32.mrf.mxu1 }
 0x13b   :  { %v430_v58 = vadd.f32 %v887_v27, %v429_v55 }
 0x13d   :  { %502 = vst [vmem:[#allocation2 + $0x28] sm:$0xff] %v430_v58 }
 0x142   :  { %v432_v62 = vpop.f32.mrf.mxu1 }
 0x143   :  { %v433_v63 = vadd.f32 %v887_v27, %v432_v62 }
 0x145   :  { %503 = vst [vmem:[#allocation2 + $0x30] sm:$0xff] %v433_v63  ;;  %471 = vmatmul.bf16.gmra.mxu2 %v335_v0 }
 0x14a   :  { %v434_v2 = vpop.f32.mrf.mxu1 }
 0x14b   :  { %v435_v5 = vadd.f32 %v887_v27, %v434_v2 }
 0x14d   :  { %504 = vst [vmem:[#allocation2 + $0x38] sm:$0xff] %v435_v5 }
 0x152   :  { %v437_v9 = vpop.f32.mrf.mxu1 }
 0x153   :  { %v438_v10 = vadd.f32 %v887_v27, %v437_v9 }
 0x155   :  { %505 = vst [vmem:[#allocation2 + $0x40] sm:$0xff] %v438_v10  ;;  %476 = vmatmul.bf16.gmra.mxu2 %v336_v11 }
 0x15a   :  { %v439_v12 = vpop.f32.mrf.mxu1 }
 0x15b   :  { %v440_v16 = vadd.f32 %v887_v27, %v439_v12 }
 0x15d   :  { %506 = vst [vmem:[#allocation2 + $0x48] sm:$0xff] %v440_v16 }
 0x162   :  { %v442_v19 = vpop.f32.mrf.mxu1 }
 0x163   :  { %v443_v20 = vadd.f32 %v887_v27, %v442_v19 }
 0x165   :  { %507 = vst [vmem:[#allocation2 + $0x50] sm:$0xff] %v443_v20  ;;  %481 = vmatmul.bf16.gmra.mxu2 %v337_v21 }
 0x16a   :  { %v444_v24 = vpop.f32.mrf.mxu1 }
 0x16b   :  { %v445_v28 = vadd.f32 %v887_v27, %v444_v24 }
 0x16d   :  { %508 = vst [vmem:[#allocation2 + $0x58] sm:$0xff] %v445_v28 }
 0x172   :  { %v447_v32 = vpop.f32.mrf.mxu1 }
 0x173   :  { %v448_v33 = vadd.f32 %v887_v27, %v447_v32 }
 0x175   :  { %509 = vst [vmem:[#allocation2 + $0x60] sm:$0xff] %v448_v33  ;;  %486 = vmatmul.bf16.gmra.mxu2 %v338_v34 }
 0x17a   :  { %v449_v36 = vpop.f32.mrf.mxu1 }
 0x17b   :  { %v450_v39 = vadd.f32 %v887_v27, %v449_v36 }
 0x17d   :  { %510 = vst [vmem:[#allocation2 + $0x68] sm:$0xff] %v450_v39 }
 0x182   :  { %v452_v42 = vpop.f32.mrf.mxu1 }
 0x183   :  { %v453_v43 = vadd.f32 %v887_v27, %v452_v42 }
 0x185   :  { %511 = vst [vmem:[#allocation2 + $0x70] sm:$0xff] %v453_v43  ;;  %491 = vmatmul.bf16.gmra.mxu2 %v339_v44 }
 0x18a   :  { %v454_v45 = vpop.f32.mrf.mxu1 }
 0x18b   :  { %v455_v46 = vadd.f32 %v887_v27, %v454_v45 }
 0x18d   :  { %512 = vst [vmem:[#allocation2 + $0x78] sm:$0xff] %v455_v46 }
 0x198   :  { %v457_v47 = vpop.f32.mrf.mxu2 }
 0x199   :  { %v458_v48 = vadd.f32 %v887_v27, %v457_v47 }
 0x19b   :  { %513 = vst [vmem:[#allocation2 + $0x80] sm:$0xff] %v458_v48 }
 0x1a0   :  { %v459_v22 = vpop.f32.mrf.mxu2 }
 0x1a1   :  { %v460_v49 = vadd.f32 %v887_v27, %v459_v22 }
 0x1a3   :  { %514 = vst [vmem:[#allocation2 + $0x88] sm:$0xff] %v460_v49 }
 0x1a8   :  { %v462_v50 = vpop.f32.mrf.mxu2 }
 0x1a9   :  { %v463_v51 = vadd.f32 %v887_v27, %v462_v50 }
 0x1ab   :  { %515 = vst [vmem:[#allocation2 + $0x90] sm:$0xff] %v463_v51 }
 0x1b0   :  { %v464_v52 = vpop.f32.mrf.mxu2 }
 0x1b1   :  { %v465_v53 = vadd.f32 %v887_v27, %v464_v52 }
 0x1b3   :  { %516 = vst [vmem:[#allocation2 + $0x98] sm:$0xff] %v465_v53 }
 0x1b8   :  { %v467_v54 = vpop.f32.mrf.mxu2 }
 0x1b9   :  { %v468_v55 = vadd.f32 %v887_v27, %v467_v54 }
 0x1bb   :  { %517 = vst [vmem:[#allocation2 + $0xa0] sm:$0xff] %v468_v55 }
 0x1c0   :  { %v469_v56 = vpop.f32.mrf.mxu2 }
 0x1c1   :  { %v470_v57 = vadd.f32 %v887_v27, %v469_v56 }
 0x1c3   :  { %518 = vst [vmem:[#allocation2 + $0xa8] sm:$0xff] %v470_v57 }
 0x1c8   :  { %v472_v58 = vpop.f32.mrf.mxu2 }
 0x1c9   :  { %v473_v59 = vadd.f32 %v887_v27, %v472_v58 }
 0x1cb   :  { %519 = vst [vmem:[#allocation2 + $0xb0] sm:$0xff] %v473_v59 }
 0x1d0   :  { %v474_v60 = vpop.f32.mrf.mxu2 }
 0x1d1   :  { %v475_v61 = vadd.f32 %v887_v27, %v474_v60 }
 0x1d3   :  { %520 = vst [vmem:[#allocation2 + $0xb8] sm:$0xff] %v475_v61 }
 0x1d8   :  { %v477_v62 = vpop.f32.mrf.mxu2 }
 0x1d9   :  { %v478_v63 = vadd.f32 %v887_v27, %v477_v62 }
 0x1db   :  { %521 = vst [vmem:[#allocation2 + $0xc0] sm:$0xff] %v478_v63 }
 0x1e0   :  { %v479_v0 = vpop.f32.mrf.mxu2 }
 0x1e1   :  { %v480_v1 = vadd.f32 %v887_v27, %v479_v0 }
 0x1e3   :  { %522 = vst [vmem:[#allocation2 + $0xc8] sm:$0xff] %v480_v1 }
 0x1e8   :  { %v482_v2 = vpop.f32.mrf.mxu2 }
 0x1e9   :  { %v483_v3 = vadd.f32 %v887_v27, %v482_v2 }
 0x1eb   :  { %523 = vst [vmem:[#allocation2 + $0xd0] sm:$0xff] %v483_v3 }
 0x1f0   :  { %v484_v4 = vpop.f32.mrf.mxu2 }
 0x1f1   :  { %v485_v5 = vadd.f32 %v887_v27, %v484_v4 }
 0x1f3   :  { %524 = vst [vmem:[#allocation2 + $0xd8] sm:$0xff] %v485_v5 }
 0x1f8   :  { %v487_v6 = vpop.f32.mrf.mxu2 }
 0x1f9   :  { %v488_v7 = vadd.f32 %v887_v27, %v487_v6 }
 0x1fb   :  { %525 = vst [vmem:[#allocation2 + $0xe0] sm:$0xff] %v488_v7 }
 0x200   :  { %v489_v8 = vpop.f32.mrf.mxu2 }
 0x201   :  { %v490_v9 = vadd.f32 %v887_v27, %v489_v8 }
 0x203   :  { %526 = vst [vmem:[#allocation2 + $0xe8] sm:$0xff] %v490_v9 }
 0x208   :  { %v492_v10 = vpop.f32.mrf.mxu2 }
 0x209   :  { %v493_v11 = vadd.f32 %v887_v27, %v492_v10 }
 0x20b   :  { %527 = vst [vmem:[#allocation2 + $0xf0] sm:$0xff] %v493_v11 }
 0x210   :  { %v494_v12 = vpop.f32.mrf.mxu2 }
 0x211   :  { %v495_v13 = vadd.f32 %v887_v27, %v494_v12 }
 0x213   :  { %528 = vst [vmem:[#allocation2 + $0xf8] sm:$0xff] %v495_v13 }
 0x214   :  { %541 = dma.vmem_to_hbm [thread:$0]  %s534_s19, 4096, %s536_s22, [#allocation3], %s735_s23, %s735_s23, %s736_s24  }
 0x215   :  { %732 = dma.done.wait [#allocation3], 4096  }
 0x216   :  { %733 = vsyncadd [#allocation3], 4294963200 }
 0x217   :  { %546 = vsyncpa [#allocation3], 1 }

</bundles_post_ra>
